<compile_context>
chip_gen: v7x
topology: tpu7x:2x2x1
jax: 0.10.0
libtpu: 0.0.40
codegen_flags: <defaults>
</compile_context>

<pallas_src>
import math

import jax
import jax.numpy as jnp
from jax.experimental import pallas as pl
from jax.experimental.pallas import tpu as pltpu


def _vmem_limit_bytes():
    # Generation-aware VMEM budget: ~3/4 of physical, capped at 100 MiB.
    # v5e/v6e (128 MiB) -> ~96 MiB; v7x (64 MiB) -> 48 MiB.
    try:
        cap = int(pltpu.get_tpu_info().vmem_capacity_bytes)
    except Exception:  # conservative fallback if the query is unavailable
        cap = 64 * 1024 * 1024
    return min(cap * 3 // 4, 100 * 1024 * 1024)


def _pick_tile(S):
    # x is streamed from HBM exactly once regardless of T, while per-tile mask/exp/MXU
    # work grows with T; T=512 amortizes the ~0.35us/step pipeline overhead without
    # blowing up the (T,T) intermediates. Small S runs as one 8-aligned padded tile.
    if S <= 512:
        return max(8, ((S + 7) // 8) * 8)
    for t in (512, 256, 128):
        if S % t == 0:
            return t
    return 512  # S is padded up to a multiple of T in the wrapper


# ----------------------------------------------------------------------------
# Pass 1: self-attention scores  s = attn_2(tanh(attn_1(x)))
# (attn_2 bias dropped — a per-row constant cancels in the prefix softmax)
# ----------------------------------------------------------------------------
def _scores_kernel(x_ref, w1t_ref, b1_ref, w2_ref, s_ref):
    # x_ref  : (1, T, Dp)  bf16 block of x
    # w1t_ref: (Dp, Dp)    bf16 attn_1.weight^T (pre-transposed, pre-cast in wrapper)
    # b1_ref : (1, Dp)     f32  attn_1.bias
    # w2_ref : (1, Dp)     f32  attn_2.weight
    # s_ref  : (1, T, 1)   f32  scores output block
    x = x_ref[0]                                                    # (T, Dp) bf16
    h = jnp.tanh(
        jnp.dot(x, w1t_ref[...], preferred_element_type=jnp.float32)
        + b1_ref[...]
    )                                                               # (T, Dp) f32
    # attn_2 projection as a VPU mul + XLU row-reduce (avoids a degenerate (Dp,1) matmul).
    s_ref[0] = jnp.sum(h * w2_ref[...], axis=-1, keepdims=True)     # (T, 1)


# ----------------------------------------------------------------------------
# Pass 2: causal prefix softmax + context as a carried single sweep.
# grid = (B, nq); per-batch row state carried in VMEM scratch across q tiles.
# ----------------------------------------------------------------------------
def _context_kernel(s_ref, x_ref, o_ref, m_sc, num_sc, den_sc):
    # s_ref  : (1, 1, 1, T)  f32  lane-dense scores for this q tile
    # x_ref  : (1, T, Dp)    bf16 x block for this q tile
    # o_ref  : (1, T, Dp)    f32  context output block
    # m_sc   : (1, 1)  f32  carried running max over all previous tiles
    # num_sc : (1, Dp) f32  carried numerator  (at reference m_sc)
    # den_sc : (1, 1)  f32  carried denominator (at reference m_sc)
    T = x_ref.shape[1]
    q_idx = pl.program_id(1)

    @pl.when(q_idx == 0)
    def _init():
        m_sc[...] = jnp.full_like(m_sc, -jnp.inf)
        num_sc[...] = jnp.zeros_like(num_sc)
        den_sc[...] = jnp.zeros_like(den_sc)

    s = s_ref[0, 0]                                          # (1, T) f32
    x_k = x_ref[0]                                           # (T, Dp) bf16

    # Lower-triangular causal mask within the tile (local iotas; global offsets cancel).
    row = jax.lax.broadcasted_iota(jnp.int32, (T, T), 0)
    col = jax.lax.broadcasted_iota(jnp.int32, (T, T), 1)
    logits = jnp.where(col <= row, jnp.broadcast_to(s, (T, T)), -jnp.inf)

    m_carry = m_sc[...]                                      # (1, 1)
    row_max = jnp.max(logits, axis=-1, keepdims=True)        # (T, 1) prefix-cummax of s
    m_row = jnp.maximum(row_max, m_carry)                    # (T, 1) per-row reference
    alpha = jnp.exp(m_carry - m_row)                         # (T, 1) carried-state rescale
    p = jnp.exp(logits - m_row)                              # (T, T); masked entries -> 0

    # In-tile prefixes: masked (T,T)@(T,Dp) matmul on the MXU + row sums, then
    # combine with the carried (1,Dp)/(1,1) row state.
    num = alpha * num_sc[...] + jnp.dot(
        p.astype(jnp.bfloat16), x_k, preferred_element_type=jnp.float32)   # (T, Dp)
    den = alpha * den_sc[...] + jnp.sum(p, axis=-1, keepdims=True)         # (T, 1)

    # den >= 1 always (the running max is attained by some score), so exact divide is safe.
    o_ref[0] = (num * (1.0 / den)).astype(o_ref.dtype)

    # Fold the whole tile into the carried state: row T-1 already holds the full
    # prefix through this tile at reference m_row[T-1] = max(m_carry, tile_max).
    m_sc[...] = m_row[T - 1:, :]
    num_sc[...] = num[T - 1:, :]
    den_sc[...] = den[T - 1:, :]


def attention_forward(x, w1, b1, w2, b2=None, *, block=None):
    """x: (B, S, D) f32. w1: (D, D), b1: (D,), w2: (1, D), b2: (1,) (unused — a
    constant shift of every logit cancels in the prefix softmax). Returns (B, S, D) f32."""
    del b2
    B, S, D = x.shape
    T = _pick_tile(S) if block is None else block
    assert T % 8 == 0, "tile size must be a multiple of 8"
    nq = pl.cdiv(S, T)
    Sp = nq * T
    Dp = ((D + 127) // 128) * 128
    vmem_limit = _vmem_limit_bytes()

    # Zero-pad the feature dim to a lane-dense multiple of 128 and the sequence dim
    # to a tile multiple. Trailing zero rows never enter any real row's causal prefix
    # and padded feature columns stay identically zero; both are sliced off below.
    if Dp != D or Sp != S:
        x_p = jnp.pad(x, ((0, 0), (0, Sp - S), (0, Dp - D)))
        w1_p = jnp.pad(w1, ((0, Dp - D), (0, Dp - D)))
        b1_p = jnp.pad(b1, (0, Dp - D))
        w2_p = jnp.pad(w2, ((0, 0), (0, Dp - D)))
    else:
        x_p, w1_p, b1_p, w2_p = x, w1, b1, w2

    # Pre-cast / pre-transpose once in XLA (not per grid step).
    x_bf = x_p.astype(jnp.bfloat16)
    w1t_bf = jnp.transpose(w1_p).astype(jnp.bfloat16)
    b1_2d = b1_p.reshape(1, Dp).astype(jnp.float32)
    w2_2d = w2_p.reshape(1, Dp).astype(jnp.float32)

    # ---------------- pass 1: scores (B, Sp, 1) ----------------
    scores = pl.pallas_call(
        _scores_kernel,
        out_shape=jax.ShapeDtypeStruct((B, Sp, 1), jnp.float32),
        grid_spec=pltpu.PrefetchScalarGridSpec(
            num_scalar_prefetch=0,
            grid=(B, nq),
            in_specs=[
                pl.BlockSpec((1, T, Dp), lambda b, i: (b, i, 0)),   # x block (bf16)
                pl.BlockSpec((Dp, Dp), lambda b, i: (0, 0)),        # attn_1.weight^T (bf16)
                pl.BlockSpec((1, Dp), lambda b, i: (0, 0)),         # attn_1.bias
                pl.BlockSpec((1, Dp), lambda b, i: (0, 0)),         # attn_2.weight
            ],
            out_specs=pl.BlockSpec((1, T, 1), lambda b, i: (b, i, 0)),
        ),
        compiler_params=pltpu.CompilerParams(
            dimension_semantics=("parallel", "parallel"),
            vmem_limit_bytes=vmem_limit),
    )(x_bf, w1t_bf, b1_2d, w2_2d)

    # Lane-dense per-tile scores for pass 2: (B, Sp, 1) -> (B, nq, 1, T).
    scores_lane = scores.reshape(B, nq, 1, T)

    # ---------------- pass 2: carried prefix-softmax sweep ----------------
    ctx = pl.pallas_call(
        _context_kernel,
        out_shape=jax.ShapeDtypeStruct((B, Sp, Dp), jnp.float32),
        grid_spec=pltpu.PrefetchScalarGridSpec(
            num_scalar_prefetch=0,
            grid=(B, nq),
            in_specs=[
                pl.BlockSpec((1, 1, 1, T), lambda b, q: (b, q, 0, 0)),
                pl.BlockSpec((1, T, Dp), lambda b, q: (b, q, 0)),
            ],
            out_specs=pl.BlockSpec((1, T, Dp), lambda b, q: (b, q, 0)),
            scratch_shapes=[
                pltpu.VMEM((1, 1), jnp.float32),     # carried running max
                pltpu.VMEM((1, Dp), jnp.float32),    # carried numerator
                pltpu.VMEM((1, 1), jnp.float32),     # carried denominator
            ],
        ),
        compiler_params=pltpu.CompilerParams(
            dimension_semantics=("parallel", "arbitrary"),
            vmem_limit_bytes=vmem_limit),
    )(scores_lane, x_bf)

    if Dp != D or Sp != S:
        return ctx[:, :S, :D]
    return ctx


# ----------------------------------------------------------------------------
# Reference + test harness
# ----------------------------------------------------------------------------
def _xavier_uniform(key, shape):
    # PyTorch nn.init.xavier_uniform_ for a (fan_out, fan_in) weight.
    fan_out, fan_in = shape
    bound = math.sqrt(6.0 / (fan_in + fan_out))
    return jax.random.uniform(key, shape, jnp.float32, -bound, bound)


def _reference(x, w1, b1, w2, b2):
    # Plain-JAX reference mirroring the PyTorch loop (f32).
    scores = jnp.tanh(x @ w1.T + b1) @ w2.T + b2               # (B, S, 1)
    B, S, D = x.shape
    ctxs = []
    for t in range(S):
        w = jax.nn.softmax(scores[:, : t + 1, :], axis=1)      # (B, t+1, 1)
        ctxs.append(jnp.sum(w * x[:, : t + 1, :], axis=1))     # (B, D)
    return jnp.stack(ctxs, axis=1)                             # (B, S, D)


if __name__ == "__main__":
    B, D = 2, 32
    key = jax.random.PRNGKey(0)
    kx, k1, k2 = jax.random.split(key, 3)

    w1 = _xavier_uniform(k1, (D, D))          # attn_1.weight
    b1 = jnp.zeros((D,), jnp.float32)         # attn_1.bias  (module fills with 0.0)
    w2 = _xavier_uniform(k2, (1, D))          # attn_2.weight
    b2 = jnp.zeros((1,), jnp.float32)         # attn_2.bias  (module fills with 0.0)

    # (S=16, block=None): single-tile path. (S=16, block=8): multi-tile carried sweep.
    # (S=20, block=8): carried sweep + sequence padding to a tile multiple.
    for S, blk in ((16, None), (16, 8), (20, 8)):
        x = jax.random.normal(jax.random.fold_in(kx, S), (B, S, D), jnp.float32)
        ref = _reference(x, w1, b1, w2, b2)
        out = jax.block_until_ready(attention_forward(x, w1, b1, w2, b2, block=blk))
        assert out.shape == (B, S, D)
        err = float(jnp.max(jnp.abs(out - ref)))
        assert jnp.allclose(out, ref, atol=3e-2, rtol=3e-2), (
            f"mismatch vs reference (S={S}, block={blk}, max abs err {err})")

    print("KERNEL_OK")
</pallas_src>

<mosaic_0001>
module attributes {stable_mosaic.version = 11 : i64} {
  func.func @_scores_kernel(%arg0: i32, %arg1: i32, %arg2: memref<1x16x128xbf16, #tpu.memory_space<vmem>>, %arg3: memref<128x128xbf16, #tpu.memory_space<vmem>>, %arg4: memref<1x128xf32, #tpu.memory_space<vmem>>, %arg5: memref<1x128xf32, #tpu.memory_space<vmem>>, %arg6: memref<1x16x1xf32, #tpu.memory_space<vmem>>) attributes {dimension_semantics = [#tpu.dimension_semantics<parallel>, #tpu.dimension_semantics<parallel>], iteration_bounds = array<i64: 2, 1>, scalar_prefetch = 0 : i64, scratch_operands = 0 : i64, tpu.core_type = #tpu.core_type<tc>, window_params = [{transform_indices = @transform_0, window_bounds = array<i64: 1, 16, 128>}, {pipeline_mode = #tpu.pipeline_mode<synchronous>, transform_indices = @transform_1, window_bounds = array<i64: 128, 128>}, {pipeline_mode = #tpu.pipeline_mode<synchronous>, transform_indices = @transform_2, window_bounds = array<i64: 1, 128>}, {pipeline_mode = #tpu.pipeline_mode<synchronous>, transform_indices = @transform_3, window_bounds = array<i64: 1, 128>}, {transform_indices = @transform_4, window_bounds = array<i64: 1, 16, 1>}]} {
    %c0 = arith.constant 0 : index
    %c0_0 = arith.constant 0 : index
    %c0_1 = arith.constant 0 : index
    %0 = vector.load %arg2[%c0, %c0_0, %c0_1] : memref<1x16x128xbf16, #tpu.memory_space<vmem>>, vector<1x16x128xbf16>
    %1 = vector.shape_cast %0 : vector<1x16x128xbf16> to vector<16x128xbf16>
    %c0_2 = arith.constant 0 : index
    %c0_3 = arith.constant 0 : index
    %2 = vector.load %arg3[%c0_2, %c0_3] : memref<128x128xbf16, #tpu.memory_space<vmem>>, vector<128x128xbf16>
    %cst = arith.constant dense<0.000000e+00> : vector<16x128xf32>
    %3 = tpu.matmul %1, %2, %cst {dimension_numbers = #tpu.dot_dimension_numbers<[1], [0], [0], [1], [0, 0, 1, 1], [], []>} : vector<16x128xbf16>, vector<128x128xbf16>, vector<16x128xf32> -> vector<16x128xf32>
    %c0_4 = arith.constant 0 : index
    %c0_5 = arith.constant 0 : index
    %4 = vector.load %arg4[%c0_4, %c0_5] : memref<1x128xf32, #tpu.memory_space<vmem>>, vector<1x128xf32>
    %5 = vector.broadcast %4 : vector<1x128xf32> to vector<16x128xf32>
    %6 = arith.addf %3, %5 : vector<16x128xf32>
    %7 = math.tanh %6 : vector<16x128xf32>
    %c0_6 = arith.constant 0 : index
    %c0_7 = arith.constant 0 : index
    %8 = vector.load %arg5[%c0_6, %c0_7] : memref<1x128xf32, #tpu.memory_space<vmem>>, vector<1x128xf32>
    %9 = vector.broadcast %8 : vector<1x128xf32> to vector<16x128xf32>
    %10 = arith.mulf %7, %9 : vector<16x128xf32>
    %cst_8 = arith.constant dense<0.000000e+00> : vector<16xf32>
    %11 = vector.multi_reduction <add>, %10, %cst_8 [1] : vector<16x128xf32> to vector<16xf32>
    %12 = vector.shape_cast %11 : vector<16xf32> to vector<16x1xf32>
    %c0_9 = arith.constant 0 : index
    %c0_10 = arith.constant 0 : index
    %c0_11 = arith.constant 0 : index
    %13 = vector.load %arg6[%c0_9, %c0_10, %c0_11] : memref<1x16x1xf32, #tpu.memory_space<vmem>>, vector<1x16x1xf32>
    %14 = vector.shape_cast %13 : vector<1x16x1xf32> to vector<16x1xf32>
    %15 = vector.shape_cast %12 : vector<16x1xf32> to vector<1x16x1xf32>
    tpu.vector_store %arg6[%c0_9, %c0_10, %c0_11], %15 {strides = array<i32>} : memref<1x16x1xf32, #tpu.memory_space<vmem>>, vector<1x16x1xf32>,
    return
  }
  func.func @transform_0(%arg0: i32, %arg1: i32) -> (i32, i32, i32) {
    %c0_i32 = arith.constant 0 : i32
    %c0_i32_0 = arith.constant 0 : i32
    return %arg0, %arg1, %c0_i32 : i32, i32, i32
  }
  func.func @transform_1(%arg0: i32, %arg1: i32) -> (i32, i32) {
    %c0_i32 = arith.constant 0 : i32
    %c0_i32_0 = arith.constant 0 : i32
    %c0_i32_1 = arith.constant 0 : i32
    return %c0_i32, %c0_i32_0 : i32, i32
  }
  func.func @transform_2(%arg0: i32, %arg1: i32) -> (i32, i32) {
    %c0_i32 = arith.constant 0 : i32
    %c0_i32_0 = arith.constant 0 : i32
    %c0_i32_1 = arith.constant 0 : i32
    return %c0_i32, %c0_i32_0 : i32, i32
  }
  func.func @transform_3(%arg0: i32, %arg1: i32) -> (i32, i32) {
    %c0_i32 = arith.constant 0 : i32
    %c0_i32_0 = arith.constant 0 : i32
    %c0_i32_1 = arith.constant 0 : i32
    return %c0_i32, %c0_i32_0 : i32, i32
  }
  func.func @transform_4(%arg0: i32, %arg1: i32) -> (i32, i32, i32) {
    %c0_i32 = arith.constant 0 : i32
    %c0_i32_0 = arith.constant 0 : i32
    return %arg0, %arg1, %c0_i32 : i32, i32, i32
  }
}

</mosaic_0001>

<bundles_post_ra>
// kernel: tpu_custom_call.1
= control target key start
LH: loop header
LB: loop body
LE: loop exit
PB: predicated region body
PF: predicated region fallthrough
CT: control target
= control target key end

     0   :  { %9 = vsyncpa [#allocation3], 0  ;;  %s965_s0 = inlined_call_operand.hbm [shape: bf16[2,16,128], index: 0, kind: input, shape index: {}]   ;;  %s966_s1 = inlined_call_operand.hbm [shape: bf16[128,128], index: 1, kind: input, shape index: {}]   ;;  %s967_s2 = inlined_call_operand.vmem [shape: f32[1,128], index: 2, kind: input, shape index: {}]   ;;  %s968_s3 = inlined_call_operand.vmem [shape: f32[1,128], index: 3, kind: input, shape index: {}]   ;;  %s969_s4 = inlined_call_operand.vmem [shape: f32[2,16,1], index: 4, kind: output, shape index: {}]  }
   0x1   :  { %11 = vsyncpa [#allocation3 + $0x1], 0 }
   0x2   :  { %12 = vsyncpa [#allocation5], 0  ;;  %s790_s15 = smov 0   ;;  %s792_s16 = smov 0  }
   0x3   :  { %s794_s17 = smov 0   ;;  %s796_s18 = smov 0  }
   0x4   :  { %s798_s19 = smov 0   ;;  %s800_s20 = smov 0  }
   0x5 LB: > { %s505_s21 = sadd.s32 4294967295, %s757_s20   ;;  %p52_p0 = scmp.ne.s32.totalorder %s741_s16, %s737_s15  ;;  %s757_s20 = sphi %s800_s20, %s18_s20   ;;  %s753_s19 = sphi %s798_s19, %s986_s19   ;;  %s749_s18 = sphi %s796_s18, %s985_s18   ;;  %s745_s17 = sphi %s794_s17, %s984_s17   ;;  %s741_s16 = sphi %s792_s16, %s983_s16   ;;  %s737_s15 = sphi %s790_s15, %s982_s15  }
   0x6   : > { %p820_p1 = scmp.eq.s32.totalorder %s505_s21, 0  ;;  %p507_p2 = scmp.ge.s32.totalorder %s757_s20, 1 }
   0x7   : > { %p154_p3 = scmp.lt.s32.totalorder %s757_s20, 3  ;;  %s759_s25 = smov [#allocation4]  }
   0x8   : > { %s974_s22 = scalar_select %p820_p1, 1, 0 }
   0x9   : > { %p828_p4 = por %p820_p1, %p52_p0  ;;  %p832_p5 = pnand %p507_p2, %p154_p3 }
   0xa   : > { %s166_s26 = sshll.u32 %s759_s25, 4  ;;  %s30_s28 = sadd.s32 1, %s753_s19  ;;  %s167_s26 = int_to_ptr.vmem [resolvable:$true] %s166_s26 }
   0xb   : > { %s975_s23 = scalar_select %p828_p4, 1, 0 }
   0xc   : > { %s976_s24 = scalar_select %p832_p5, 1, 0 }
   0xd   : > { %p568_p6 = pneg %p832_p5  ;;  %s645_s5 = scalar_lea.hbm %s966_s1, 1024 }
   0xe   : > { %p646_p8 = scmp.ne.s32.totalorder %s966_s1, %s645_s5  ;;  %p652_p12 = scmp.lt.u32.totalorder %s645_s5, %s966_s1 }
   0xf   : > { %p840_p7 = pnand %p568_p6, %p820_p1 }
  0x11   : > { %p647_p9 = pneg %p840_p7 }
  0x13   : > { %p648_p10 = pnand %p647_p9, %p646_p8 }
  0x15   : > { %p649_p11 = pneg %p648_p10 }
  0x17   : > { %p654_p13 = pnand %p652_p12, %p649_p11 }
  0x19   : > { %657 = shalt.err (!%p654_p13)
}
  0x1a   : > { %s658_s10 = scalar_lea.vmem %s167_s26, 1024  ;;  %p666_p6 = scmp.lt.s32.totalorder %s167_s26, %s167_s26 }
  0x1b   : > { %p659_p0 = scmp.ne.s32.totalorder %s167_s26, %s658_s10  ;;  %p667_p1 = scmp.lt.s32.totalorder %s658_s10, %s658_s10 }
  0x1d   : > { %p661_p2 = pnand %p659_p0, %p647_p9  ;;  %p668_p4 = por %p667_p1, %p666_p6 }
  0x1f   : > { %p662_p3 = pneg %p661_p2 }
  0x21   : > { %p669_p5 = pnand %p668_p4, %p662_p3 }
  0x23   : > { %672 = shalt.err (!%p669_p5)
}
  0x24   : > { %s760_s11 = smov 64   ;;  %s761_s12 = smov 4  }
  0x25   : > { %571 = dma.hbm_to_vmem [thread:$0]  (!%p840_p7), %s966_s1, 1024, %s167_s26, [#allocation5], %s760_s11, %s760_s11, %s761_s12  }
  0x26   : > { %p32_p1 = scmp.ge.s32.totalorder %s30_s28, 2  ;;  %s39_s15 = sadd.s32 1, %s745_s17 }
  0x27   : > { %p46_p4 = scmp.ne.s32.totalorder %s745_s17, %s741_s16  ;;  %p47_p5 = scmp.eq.s32.totalorder %s757_s20, 0 }
  0x28   : > { %s988_s28 = smov (%p32_p1, %s30_s28), 0  ;;  %p577_p9 = scmp.lt.s32.totalorder %s757_s20, 2 }
  0x29   : > { %p48_p8 = por %p47_p5, %p46_p4  ;;  %s34_s21 = ssub.s32 %s753_s19, %s988_s28 }
  0x2a   : > { %s186_s25 = sand.u32 1, %s745_s17   ;;  %p37_p10 = scmp.eq.s32.totalorder %s34_s21, 0 }
  0x2b   : > { %s510_s27 = sshll.u32 %s186_s25, 3  ;;  %s531_s29 = sshll.u32 %s753_s19, 7 }
  0x2c   : > { %s876_s30 = scalar_select %p37_p10, %s745_s17, %s39_s15  }
  0x2d   : > { %s881_s26 = scalar_lea.hbm %s965_s0, %s531_s29  ;;  %s190_s7 = scalar_lea.vmem [#allocation2], %s510_s27 }
  0x2e   : > { %s199_s8 = sshll.u32 %s190_s7, 4  ;;  %p883_p7 = pnand %p577_p9, %p48_p8  ;;  %s887_s8 = int_to_ptr.vmem [resolvable:$true] %s199_s8 }
  0x2f   : > { %s889_s10 = scalar_lea.sflag [#allocation3], %s186_s25  ;;  %s673_s13 = scalar_lea.hbm %s881_s26, 128 }
  0x30   : > { %p674_p11 = scmp.ne.s32.totalorder %s881_s26, %s673_s13  ;;  %p675_p12 = pneg %p883_p7 }
  0x31   : > { %s678_s21 = scalar_lea.hbm %s965_s0, 256  ;;  %p679_p2 = scmp.lt.u32.totalorder %s881_s26, %s965_s0 }
  0x32   : > { %p676_p13 = pnand %p675_p12, %p674_p11  ;;  %p680_p3 = scmp.lt.u32.totalorder %s678_s21, %s673_s13 }
  0x33   : > { %p682_p1 = scmp.lt.u32.totalorder %s673_s13, %s881_s26 }
  0x34   : > { %p677_p0 = pneg %p676_p13  ;;  %p681_p6 = por %p680_p3, %p679_p2 }
  0x36   : > { %p683_p4 = por %p682_p1, %p681_p6 }
  0x38   : > { %p684_p5 = pnand %p683_p4, %p677_p0 }
  0x3a   : > { %687 = shalt.err (!%p684_p5)
}
  0x3b   : > { %s688_s25 = scalar_lea.vmem %s887_s8, 128  ;;  %s762_s5 = smov [#allocation2]  }
  0x3c   : > { %p689_p8 = scmp.ne.s32.totalorder %s887_s8, %s688_s25  ;;  %s693_s6 = sshll.u32 %s762_s5, 4  ;;  %s694_s6 = int_to_ptr.vmem [resolvable:$false] %s693_s6 }
  0x3d   : > { %s695_s7 = scalar_lea.vmem %s694_s6, 256  ;;  %p696_p11 = scmp.lt.s32.totalorder %s887_s8, %s694_s6 }
  0x3e   : > { %p691_p9 = pnand %p689_p8, %p675_p12  ;;  %p697_p13 = scmp.lt.s32.totalorder %s695_s7, %s688_s25 }
  0x40   : > { %p692_p10 = pneg %p691_p9  ;;  %p698_p2 = por %p697_p13, %p696_p11 }
  0x42   : > { %p699_p3 = pnand %p698_p2, %p692_p10 }
  0x44   : > { %702 = shalt.err (!%p699_p3)
}
  0x45   : > { %575 = dma.hbm_to_vmem [thread:$0]  (!%p883_p7), %s881_s26, 128, %s887_s8, %s889_s10, %s760_s11, %s760_s11, %s761_s12  }
  0x46   : > { %p979_p12 = scmp.ne.s32.totalorder %s976_s24, 0 }
  0x47   : > { %s213_s13 = sand.u32 (!%p979_p12), 1, %s741_s16   ;;  %p980_p0 = scmp.ne.s32.totalorder (!%p979_p12), %s975_s23, 0 }
  0x48   : > { %211 = sbr.rel (%p979_p12) target bundleno = 490 (0x1ea), region = 36  ;;  %s923_s14 = sshll.u32 (!%p979_p12), %s213_s13, 3 }
  0x49   : > { %s214_s15 = scalar_lea.sflag (!%p979_p12), [#allocation3], %s213_s13  ;;  %s217_s21 = scalar_lea.vmem (!%p979_p12), [#allocation2], %s923_s14 }
  0x4f   : > { %728 = dma.done.wait (%p980_p0), %s214_s15, 128  }
  0x50   : > { %730 = vsyncadd (%p980_p0), %s214_s15, 4294967168  ;;  %p981_p6 = scmp.ne.s32.totalorder %s974_s22, 0 }
  0x52   : > { %732 = dma.done.wait (%p981_p6), [#allocation5], 1024  }
  0x53   : > { %734 = vsyncadd (%p981_p6), [#allocation5], 4294966272  ;;  %v763_v0 = vmov 0.0   ;;  %vm764_vm0 = vmmov 0   ;;  %v632_v1 = vld [vmem:[#allocation4] sm:$0xff]   ;;  %v633_v2 = vld [vmem:[#allocation4 + $0x8] sm:$0xff]  }
  0x54   : > { %542 = vmatprep.subr.bf16.mxu0 %v763_v0  ;;  %558 = vmatprep.mubr.msk.bf16.mxu0 %vm764_vm0, %v763_v0  ;;  %v634_v3 = vld [vmem:[#allocation4 + $0x10] sm:$0xff]   ;;  %v635_v4 = vld [vmem:[#allocation4 + $0x18] sm:$0xff]   ;;  %v636_v5 = vld [vmem:[#allocation4 + $0x20] sm:$0xff]   ;;  %p252_p7 = scmp.lt.s32.totalorder %s749_s18, 1  ;;  %vm397_vm1 = vcmask 7168  }
  0x55   : > { %543 = vmatpush3.bf16.msra.mxu0 %v632_v1  ;;  %v637_v6 = vld [vmem:[#allocation4 + $0x28] sm:$0xff]   ;;  %v638_v7 = vld [vmem:[#allocation4 + $0x30] sm:$0xff]   ;;  %v639_v8 = vld [vmem:[#allocation4 + $0x38] sm:$0xff]  }
  0x56   : > { %544 = vmatprep.subr.bf16.mxu0 %v763_v0  ;;  %v640_v9 = vld [vmem:[%s217_s21] sm:$0xff]   ;;  %s990_s18 = smov (!%p252_p7, %s749_s18), 1 }
  0x57   : > { %v518_v10 = vld [vmem:[%s967_s2] ss:$0 sm:$0xff]  ;;  %s532_s12 = sshll.u32 %s990_s18, 4 }
  0x58   : > { %v528_v17 = vld [vmem:[%s968_s3] ss:$0 sm:$0xff]  ;;  %s259_s9 = scalar_lea.vmem %s969_s4, %s532_s12 }
  0x59   : > { %545 = vmatpush3.bf16.msra.mxu0 %v633_v2 }
  0x5a   : > { %546 = vmatprep.subr.bf16.mxu0 %v763_v0 }
  0x5d   : > { %547 = vmatpush3.bf16.msra.mxu0 %v634_v3 }
  0x5e   : > { %548 = vmatprep.subr.bf16.mxu0 %v763_v0 }
  0x61   : > { %549 = vmatpush3.bf16.msra.mxu0 %v635_v4 }
  0x62   : > { %550 = vmatprep.subr.bf16.mxu0 %v763_v0 }
  0x65   : > { %551 = vmatpush3.bf16.msra.mxu0 %v636_v5 }
  0x66   : > { %552 = vmatprep.subr.bf16.mxu0 %v763_v0 }
  0x69   : > { %553 = vmatpush3.bf16.msra.mxu0 %v637_v6 }
  0x6a   : > { %554 = vmatprep.subr.bf16.mxu0 %v763_v0 }
  0x6d   : > { %555 = vmatpush3.bf16.msra.mxu0 %v638_v7 }
  0x6e   : > { %556 = vmatprep.subr.bf16.mxu0 %v763_v0 }
  0x71   : > { %557 = vmatpush3.bf16.msra.mxu0 %v639_v8 }
  0x74   : > { %559 = vmatmul.mubr.bf16.vlgmr.msra.gmra.mrb[0].mxu0 %v640_v9 }
 0x147   : > { %v375_v11 = vpop.f32.mrb[0].mxu0 }
 0x148   : > { %v376_v12 = vadd.f32 %v518_v10, %v375_v11  ;;  %v560_v13 = vpop.f32.mrb[1].mxu0 }
 0x149   : > { %v378_v14 = vpop.f32.mrb[2].mxu0 }
 0x14a   : > { %641 = vtanh.f32 %v376_v12  ;;  %v379_v15 = vadd.f32 %v518_v10, %v378_v14  ;;  %v561_v16 = vpop.f32.mrb[3].mxu0 }
 0x14c   : > { %643 = vtanh.f32 %v379_v15 }
 0x154   : > { %v642_v18 = vpop.eup %641 }
 0x155   : > { %v391_v19 = vmul.f32 %v642_v18, %v528_v17 }
 0x156   : > { %v644_v20 = vpop.eup %643 }
 0x157   : > { %393 = vadd.xlane.f32.xlu0 %v391_v19  ;;  %v392_v21 = vmul.f32 %v644_v20, %v528_v17 }
 0x15b   : > { %395 = vadd.xlane.f32.xlu0 %v392_v21 }
 0x1e4   : > { %v394_v22 = vpop.xlane.xlu0 %393 }
 0x1e5   : > { %398 = vst.msk [vmem:[%s259_s9] sm:$0xff] %vm397_vm1, %v394_v22 }
 0x1e8   : > { %v396_v23 = vpop.xlane.xlu0 %395 }
 0x1e9   : > { %399 = vst.msk [vmem:[%s259_s9 + $0x8] sm:$0xff] %vm397_vm1, %v396_v23 }
 0x1ea PF: > { %s18_s20 = sadd.s32 1, %s757_s20   ;;  %s982_s15 = smov %s741_s16 }
 0x1eb   : > { %p15_p1 = scmp.ge.s32.totalorder %s18_s20, 4   ;;  %s983_s16 = smov %s745_s17 }
 0x1ec   : > { %s984_s17 = smov %s876_s30  ;;  %s985_s18 = smov %s753_s19 }
 0x1ed   : > { %s986_s19 = smov %s988_s28  ;;  %17 = sbr.rel (!%p15_p1) target bundleno = 5 (0x5), region = 80 }
 0x1f4   :  { %430 = vsyncpa [#allocation3], 1 }
 0x1f5   :  { %432 = vsyncpa [#allocation3 + $0x1], 1 }
 0x1f6   :  { %433 = vsyncpa [#allocation5], 1 }

</bundles_post_ra>
